<compile_context>
chip_gen: v5e
topology: v5e:2x2
jax: 0.10.0
libtpu: 0.0.40
codegen_flags: <defaults>
</compile_context>

<pallas_src>
import functools
import math
from typing import NamedTuple

import jax
import jax.numpy as jnp
from jax.experimental import pallas as pl
from jax.experimental.pallas import tpu as pltpu

LANE = 128       # lane width: last dims padded to a multiple of this
SUBLANE = 16     # bf16 sublane packing (also covers the f32 8-row rule)
N_CHUNK = 512    # in-kernel output-column chunk (bounds live f32 vregs)


def _round_up(x, m):
    return ((x + m - 1) // m) * m


def _pad2d(a, rows, cols):
    # NOTE: must be ZERO padding (see correctness note at top of file).
    r, c = a.shape
    if r == rows and c == cols:
        return a
    assert rows >= r and cols >= c
    return jnp.pad(a, ((0, rows - r), (0, cols - c)))


def _physical_vmem_bytes():
    try:
        info = pltpu.get_tpu_info()
        v = getattr(info, "vmem_capacity_bytes", None)
        if v:
            return int(v)
    except Exception:
        pass
    return 64 * 1024 * 1024  # conservative default (v7x per-TensorCore VMEM)


# ~96 MiB on 128 MiB parts (v5e/v6e), ~48 MiB on v7x (64 MiB physical).
_VMEM_LIMIT_BYTES = min((_physical_vmem_bytes() * 3) // 4, 96 * 1024 * 1024)
_HAS_BUFFERED = hasattr(pl, "Buffered")


# ---------------------------------------------------------------------------
# Parameter preparation (done ONCE, outside the forward pass)
# ---------------------------------------------------------------------------
class PreparedMLP(NamedTuple):
    weights: tuple        # bf16 (d_in_p, d_out_p), zero-padded
    biases: tuple         # f32  (1, d_out_p), zero-padded
    dims: tuple           # true feature dims (d0, ..., dL)
    dims_p: tuple         # lane-padded feature dims
    compute_dtype: object


def prepare_mlp_params(params, d_in, compute_dtype=jnp.bfloat16):
    """Pad to lane multiples and cast weights (bf16) / biases (f32) once."""
    dims = [d_in] + [w.shape[1] for (w, _) in params]
    dims_p = [_round_up(d, LANE) for d in dims]
    ws, bs = [], []
    for (w, b), dip, dop in zip(params, dims_p[:-1], dims_p[1:]):
        ws.append(_pad2d(w, dip, dop).astype(compute_dtype))
        bs.append(_pad2d(b.reshape(1, -1), 1, dop).astype(jnp.float32))
    return PreparedMLP(tuple(ws), tuple(bs), tuple(dims), tuple(dims_p),
                       compute_dtype)


# ---------------------------------------------------------------------------
# Fused kernel: the whole MLP in one pallas_call
# refs = (x_ref, w_0, b_0, ..., w_{L-1}, b_{L-1}, o_ref)
# ---------------------------------------------------------------------------
def _mlp_fused_kernel(*refs, num_layers, acts, compute_dtype):
    x_ref = refs[0]
    o_ref = refs[-1]
    h = x_ref[...].astype(compute_dtype)
    for i in range(num_layers):
        w_ref = refs[1 + 2 * i]
        b_ref = refs[2 + 2 * i]
        act = acts[i]
        last = (i + 1 == num_layers)
        d_out = w_ref.shape[1]
        step = min(N_CHUNK, d_out)
        chunks = []
        for c0 in range(0, d_out, step):          # static unroll; bounds f32 live range
            c1 = min(c0 + step, d_out)
            y = jnp.dot(h, w_ref[:, c0:c1], preferred_element_type=jnp.float32)
            y = act(y + b_ref[:, c0:c1])          # bias + activation in f32
            if last:
                o_ref[:, c0:c1] = y.astype(o_ref.dtype)
            else:
                chunks.append(y.astype(compute_dtype))
        if not last:
            h = chunks[0] if len(chunks) == 1 else jnp.concatenate(chunks, axis=1)


def _weight_specs(dims_p, single_buffer):
    specs = []
    for dip, dop in zip(dims_p[:-1], dims_p[1:]):
        if single_buffer:
            # Constant index_map -> one resident buffer is enough; halves
            # the weight VMEM footprint vs. the default double-buffering.
            specs.append(pl.BlockSpec((dip, dop), lambda i: (0, 0),
                                      pipeline_mode=pl.Buffered(1)))
            specs.append(pl.BlockSpec((1, dop), lambda i: (0, 0),
                                      pipeline_mode=pl.Buffered(1)))
        else:
            specs.append(pl.BlockSpec((dip, dop), lambda i: (0, 0)))
            specs.append(pl.BlockSpec((1, dop), lambda i: (0, 0)))
    return specs


def mlp_forward_fused(prep, x, acts, *, batch_tile=256):
    compute_dtype = prep.compute_dtype
    dims, dims_p = prep.dims, prep.dims_p
    L = len(prep.weights)
    B = x.shape[0]
    assert x.shape[1] == dims[0]

    B_p = _round_up(B, SUBLANE)
    tm = min(batch_tile, B_p)
    if B_p >= 2 * SUBLANE:
        # Split the batch axis into >= 2 grid steps so the single "parallel"
        # axis can shard across both TensorCores on v7x (free on v5e/v6e).
        tm = min(tm, _round_up(B_p // 2, SUBLANE))
    tm = max(SUBLANE, tm)
    B_p = _round_up(B_p, tm)
    grid_m = B_p // tm

    x_p = _pad2d(x, B_p, dims_p[0]).astype(compute_dtype)
    operands = [x_p]
    for w_p, b_p in zip(prep.weights, prep.biases):
        operands.extend([w_p, b_p])

    itemsize = jnp.dtype(compute_dtype).itemsize
    flops = int(sum(2 * B_p * a * b for a, b in zip(dims_p[:-1], dims_p[1:])))
    bytes_accessed = int(
        B_p * dims_p[0] * itemsize
        + sum(a * b * itemsize for a, b in zip(dims_p[:-1], dims_p[1:]))
        + sum(d * 4 for d in dims_p[1:])
        + B_p * dims_p[-1] * itemsize)
    transcendentals = int(B_p * sum(dims_p[1:]))   # count every layer's act

    kernel = functools.partial(_mlp_fused_kernel, num_layers=L,
                               acts=tuple(acts), compute_dtype=compute_dtype)

    def build_and_call(single_buffer):
        in_specs = ([pl.BlockSpec((tm, dims_p[0]), lambda i: (i, 0))]
                    + _weight_specs(dims_p, single_buffer))
        return pl.pallas_call(
            kernel,
            out_shape=jax.ShapeDtypeStruct((B_p, dims_p[-1]), compute_dtype),
            grid_spec=pltpu.PrefetchScalarGridSpec(
                num_scalar_prefetch=0,
                grid=(grid_m,),
                in_specs=in_specs,
                out_specs=pl.BlockSpec((tm, dims_p[-1]), lambda i: (i, 0)),
            ),
            compiler_params=pltpu.CompilerParams(
                dimension_semantics=("parallel",),
                vmem_limit_bytes=_VMEM_LIMIT_BYTES,
            ),
            cost_estimate=pl.CostEstimate(flops=flops,
                                          transcendentals=transcendentals,
                                          bytes_accessed=bytes_accessed),
        )(*operands)

    if _HAS_BUFFERED:
        try:
            out_p = build_and_call(single_buffer=True)
        except Exception:
            out_p = build_and_call(single_buffer=False)
    else:
        out_p = build_and_call(single_buffer=False)

    # Kernel stores bf16 (halves vst/HBM bytes); cast the small slice outside.
    return out_p[:B, :dims[-1]].astype(jnp.float32)


# ---------------------------------------------------------------------------
# Tiled fallback: one padded layer y = act(x @ W + b) on an (M, N, K) grid.
# Bias + activation only in the k == last epilogue on the f32 accumulator.
# ---------------------------------------------------------------------------
def _largest_divisor(n, candidates):
    for c in candidates:
        if n % c == 0:
            return c
    return min(n, candidates[-1])


def _linear_act_tiled_kernel(x_ref, w_ref, b_ref, o_ref, acc_ref, *, act):
    k = pl.program_id(2)

    @pl.when(k == 0)
    def _():
        acc_ref[...] = jnp.zeros_like(acc_ref)

    acc_ref[...] += jnp.dot(x_ref[...], w_ref[...],
                            preferred_element_type=jnp.float32)

    @pl.when(k == pl.num_programs(2) - 1)
    def _():
        o_ref[...] = act(acc_ref[...] + b_ref[...]).astype(o_ref.dtype)


def linear_act_tiled(x_p, w_p, b_p, act, *, out_dtype):
    M_p, K_p = x_p.shape
    K2, N_p = w_p.shape
    assert K_p == K2 and M_p % 8 == 0 and K_p % LANE == 0 and N_p % LANE == 0
    # Large tiles (128 MiB-VMEM parts are badly under-used at 128-class
    # tiles); candidates are divisors of the lane-padded dims so the
    # pre-padded weights never need re-padding.  Even the largest combo
    # (256x512x2048 bf16, double-buffered) stays well under v7x's 64 MiB.
    tm = _largest_divisor(M_p, (256, 128, 64, 32, 16, 8))
    tn = _largest_divisor(N_p, (512, 384, 256, 128))
    tk = _largest_divisor(K_p, (2048, 1536, 1024, 768, 512, 384, 256, 128))

    bytes_accessed = int(M_p * K_p * x_p.dtype.itemsize
                         + K_p * N_p * w_p.dtype.itemsize
                         + N_p * 4
                         + M_p * N_p * jnp.dtype(out_dtype).itemsize)

    return pl.pallas_call(
        functools.partial(_linear_act_tiled_kernel, act=act),
        out_shape=jax.ShapeDtypeStruct((M_p, N_p), out_dtype),
        grid_spec=pltpu.PrefetchScalarGridSpec(
            num_scalar_prefetch=0,
            grid=(M_p // tm, N_p // tn, K_p // tk),
            in_specs=[
                pl.BlockSpec((tm, tk), lambda i, j, k: (i, k)),
                pl.BlockSpec((tk, tn), lambda i, j, k: (k, j)),
                pl.BlockSpec((1, tn), lambda i, j, k: (0, j)),
            ],
            out_specs=pl.BlockSpec((tm, tn), lambda i, j, k: (i, j)),
            scratch_shapes=[pltpu.VMEM((tm, tn), jnp.float32)],
        ),
        compiler_params=pltpu.CompilerParams(
            dimension_semantics=("parallel", "parallel", "arbitrary"),
            vmem_limit_bytes=_VMEM_LIMIT_BYTES,
        ),
        cost_estimate=pl.CostEstimate(flops=int(2 * M_p * K_p * N_p),
                                      transcendentals=int(M_p * N_p),
                                      bytes_accessed=bytes_accessed),
    )(x_p, w_p, b_p)


# ---------------------------------------------------------------------------
# MLP wrapper (mirrors the PyTorch module's forward pass semantics)
# ---------------------------------------------------------------------------
def init_mlp_params(key, layer_dims):
    """Deterministic init mimicking nn.Linear default (uniform +/- 1/sqrt(d_in)).

    Weight layout is (d_in, d_out) (transposed from PyTorch's (d_out, d_in))
    so the kernel is a plain x @ W matmul on the MXU.
    """
    params = []
    for d_in, d_out in zip(layer_dims[:-1], layer_dims[1:]):
        kw, kb, key = jax.random.split(key, 3)
        bound = 1.0 / math.sqrt(d_in)
        w = jax.random.uniform(kw, (d_in, d_out), jnp.float32, -bound, bound)
        b = jax.random.uniform(kb, (d_out,), jnp.float32, -bound, bound)
        params.append((w, b))
    return params


def mlp_forward(params, x, activation, activation_output, *,
                compute_dtype=jnp.bfloat16, force_tiled=False):
    prep = (params if isinstance(params, PreparedMLP)
            else prepare_mlp_params(params, x.shape[1], compute_dtype))
    L = len(prep.weights)
    acts = [activation] * (L - 1) + [activation_output]
    dims, dims_p = prep.dims, prep.dims_p
    B = x.shape[0]
    itemsize = jnp.dtype(prep.compute_dtype).itemsize

    # Fused-path VMEM footprint estimate: weights (single- or double-buffered
    # depending on pl.Buffered availability), double-buffered I/O tiles, live
    # bf16 activations, per-chunk f32 intermediate, plus compiler scratch.
    B_p = _round_up(B, SUBLANE)
    tm = min(256, B_p)
    w_mult = 1 if _HAS_BUFFERED else 2
    fused_bytes = (
        w_mult * sum(a * b * itemsize for a, b in zip(dims_p[:-1], dims_p[1:]))
        + w_mult * sum(d * 4 for d in dims_p[1:])
        + 2 * tm * dims_p[0] * itemsize                 # x tile, double-buffered
        + 2 * tm * dims_p[-1] * itemsize                # out tile, double-buffered
        + 4 * tm * max(dims_p) * itemsize               # live bf16 activations
        + 2 * tm * min(N_CHUNK, max(dims_p)) * 4        # f32 chunk + slack
        + 2 * 1024 * 1024)                              # compiler scratch fudge

    if not force_tiled and fused_bytes <= _VMEM_LIMIT_BYTES:
        try:
            return mlp_forward_fused(prep, x, acts)
        except Exception:
            pass  # fall through to the per-layer tiled path

    # Per-layer tiled path: activations stay padded + bf16 between layers
    # (half the inter-layer HBM traffic); only the last layer stores f32.
    M_p = _round_up(B, SUBLANE)
    h = _pad2d(x, M_p, dims_p[0]).astype(prep.compute_dtype)
    for i, (w_p, b_p) in enumerate(zip(prep.weights, prep.biases)):
        last = (i + 1 == L)
        h = linear_act_tiled(
            h, w_p, b_p, acts[i],
            out_dtype=jnp.float32 if last else prep.compute_dtype)
    return h[:B, :dims[-1]]


def _reference(params, x, activation, activation_output):
    h = x
    for (w, b) in params[:-1]:
        h = activation(h @ w + b)
    w, b = params[-1]
    return activation_output(h @ w + b)


# ---------------------------------------------------------------------------
if __name__ == "__main__":
    activation = jax.nn.relu          # self.activation
    activation_output = jnp.tanh      # self.activation_output

    # --- small shapes consistent with the module (fused single-kernel path) ---
    layer_dims = [16, 32, 32, 8]
    batch = 8
    key = jax.random.PRNGKey(0)
    kx, kp = jax.random.split(key)
    x = jax.random.normal(kx, (batch, layer_dims[0]), jnp.float32)
    params = init_mlp_params(kp, layer_dims)
    prep = prepare_mlp_params(params, layer_dims[0])   # pad + cast weights ONCE

    out = mlp_forward(prep, x, activation, activation_output)
    out = jax.block_until_ready(out)
    ref = _reference(params, x, activation, activation_output)
    assert out.shape == (batch, layer_dims[-1])
    # bf16 inputs + f32 accumulation (+ one bf16 output rounding) -> relaxed tol
    assert jnp.allclose(out, ref, atol=5e-2, rtol=5e-2), \
        float(jnp.max(jnp.abs(out - ref)))

    # --- exercise the tiled (M, N, K) fallback path as well ---
    layer_dims2 = [256, 512, 384, 128]
    batch2 = 64
    kx2, kp2 = jax.random.split(jax.random.PRNGKey(1))
    x2 = jax.random.normal(kx2, (batch2, layer_dims2[0]), jnp.float32)
    params2 = init_mlp_params(kp2, layer_dims2)
    prep2 = prepare_mlp_params(params2, layer_dims2[0])
    out2 = mlp_forward(prep2, x2, activation, activation_output,
                       force_tiled=True)
    out2 = jax.block_until_ready(out2)
    ref2 = _reference(params2, x2, activation, activation_output)
    assert out2.shape == (batch2, layer_dims2[-1])
    assert jnp.allclose(out2, ref2, atol=5e-2, rtol=5e-2), \
        float(jnp.max(jnp.abs(out2 - ref2)))

    print("KERNEL_OK")
</pallas_src>

<mosaic_0001>
module attributes {stable_mosaic.version = 11 : i64} {
  func.func @_mlp_fused_kernel(%arg0: i32, %arg1: memref<16x128xbf16, #tpu.memory_space<vmem>>, %arg2: memref<128x128xbf16, #tpu.memory_space<vmem>>, %arg3: memref<1x128xf32, #tpu.memory_space<vmem>>, %arg4: memref<128x128xbf16, #tpu.memory_space<vmem>>, %arg5: memref<1x128xf32, #tpu.memory_space<vmem>>, %arg6: memref<128x128xbf16, #tpu.memory_space<vmem>>, %arg7: memref<1x128xf32, #tpu.memory_space<vmem>>, %arg8: memref<16x128xbf16, #tpu.memory_space<vmem>>) attributes {dimension_semantics = [#tpu.dimension_semantics<parallel>], iteration_bounds = array<i64: 1>, scalar_prefetch = 0 : i64, scratch_operands = 0 : i64, tpu.core_type = #tpu.core_type<tc>, window_params = [{transform_indices = @transform_0, window_bounds = array<i64: 16, 128>}, {pipeline_mode = #tpu.pipeline_mode<synchronous>, transform_indices = @transform_1, window_bounds = array<i64: 128, 128>}, {pipeline_mode = #tpu.pipeline_mode<synchronous>, transform_indices = @transform_2, window_bounds = array<i64: 1, 128>}, {pipeline_mode = #tpu.pipeline_mode<synchronous>, transform_indices = @transform_3, window_bounds = array<i64: 128, 128>}, {pipeline_mode = #tpu.pipeline_mode<synchronous>, transform_indices = @transform_4, window_bounds = array<i64: 1, 128>}, {pipeline_mode = #tpu.pipeline_mode<synchronous>, transform_indices = @transform_5, window_bounds = array<i64: 128, 128>}, {pipeline_mode = #tpu.pipeline_mode<synchronous>, transform_indices = @transform_6, window_bounds = array<i64: 1, 128>}, {transform_indices = @transform_7, window_bounds = array<i64: 16, 128>}]} {
    %c0 = arith.constant 0 : index
    %c0_0 = arith.constant 0 : index
    %0 = vector.load %arg1[%c0, %c0_0] : memref<16x128xbf16, #tpu.memory_space<vmem>>, vector<16x128xbf16>
    %c0_1 = arith.constant 0 : index
    %c0_2 = arith.constant 0 : index
    %1 = vector.load %arg2[%c0_1, %c0_2] : memref<128x128xbf16, #tpu.memory_space<vmem>>, vector<128x128xbf16>
    %cst = arith.constant dense<0.000000e+00> : vector<16x128xf32>
    %2 = tpu.matmul %0, %1, %cst {dimension_numbers = #tpu.dot_dimension_numbers<[1], [0], [0], [1], [0, 0, 1, 1], [], []>} : vector<16x128xbf16>, vector<128x128xbf16>, vector<16x128xf32> -> vector<16x128xf32>
    %c0_3 = arith.constant 0 : index
    %c0_4 = arith.constant 0 : index
    %3 = vector.load %arg3[%c0_3, %c0_4] : memref<1x128xf32, #tpu.memory_space<vmem>>, vector<1x128xf32>
    %4 = vector.broadcast %3 : vector<1x128xf32> to vector<16x128xf32>
    %5 = arith.addf %2, %4 : vector<16x128xf32>
    %cst_5 = arith.constant 0.000000e+00 : f32
    %6 = vector.broadcast %cst_5 : f32 to vector<16x128xf32>
    %7 = arith.maximumf %5, %6 : vector<16x128xf32>
    %8 = arith.truncf %7 : vector<16x128xf32> to vector<16x128xbf16>
    %c0_6 = arith.constant 0 : index
    %c0_7 = arith.constant 0 : index
    %9 = vector.load %arg4[%c0_6, %c0_7] : memref<128x128xbf16, #tpu.memory_space<vmem>>, vector<128x128xbf16>
    %cst_8 = arith.constant dense<0.000000e+00> : vector<16x128xf32>
    %10 = tpu.matmul %8, %9, %cst_8 {dimension_numbers = #tpu.dot_dimension_numbers<[1], [0], [0], [1], [0, 0, 1, 1], [], []>} : vector<16x128xbf16>, vector<128x128xbf16>, vector<16x128xf32> -> vector<16x128xf32>
    %c0_9 = arith.constant 0 : index
    %c0_10 = arith.constant 0 : index
    %11 = vector.load %arg5[%c0_9, %c0_10] : memref<1x128xf32, #tpu.memory_space<vmem>>, vector<1x128xf32>
    %12 = vector.broadcast %11 : vector<1x128xf32> to vector<16x128xf32>
    %13 = arith.addf %10, %12 : vector<16x128xf32>
    %cst_11 = arith.constant 0.000000e+00 : f32
    %14 = vector.broadcast %cst_11 : f32 to vector<16x128xf32>
    %15 = arith.maximumf %13, %14 : vector<16x128xf32>
    %16 = arith.truncf %15 : vector<16x128xf32> to vector<16x128xbf16>
    %c0_12 = arith.constant 0 : index
    %c0_13 = arith.constant 0 : index
    %17 = vector.load %arg6[%c0_12, %c0_13] : memref<128x128xbf16, #tpu.memory_space<vmem>>, vector<128x128xbf16>
    %cst_14 = arith.constant dense<0.000000e+00> : vector<16x128xf32>
    %18 = tpu.matmul %16, %17, %cst_14 {dimension_numbers = #tpu.dot_dimension_numbers<[1], [0], [0], [1], [0, 0, 1, 1], [], []>} : vector<16x128xbf16>, vector<128x128xbf16>, vector<16x128xf32> -> vector<16x128xf32>
    %c0_15 = arith.constant 0 : index
    %c0_16 = arith.constant 0 : index
    %19 = vector.load %arg7[%c0_15, %c0_16] : memref<1x128xf32, #tpu.memory_space<vmem>>, vector<1x128xf32>
    %20 = vector.broadcast %19 : vector<1x128xf32> to vector<16x128xf32>
    %21 = arith.addf %18, %20 : vector<16x128xf32>
    %22 = math.tanh %21 : vector<16x128xf32>
    %23 = arith.truncf %22 : vector<16x128xf32> to vector<16x128xbf16>
    %c0_17 = arith.constant 0 : index
    %c0_18 = arith.constant 0 : index
    %24 = vector.load %arg8[%c0_17, %c0_18] : memref<16x128xbf16, #tpu.memory_space<vmem>>, vector<16x128xbf16>
    tpu.vector_store %arg8[%c0_17, %c0_18], %23 {strides = array<i32>} : memref<16x128xbf16, #tpu.memory_space<vmem>>, vector<16x128xbf16>,
    return
  }
  func.func @transform_0(%arg0: i32) -> (i32, i32) {
    %c0_i32 = arith.constant 0 : i32
    %c0_i32_0 = arith.constant 0 : i32
    return %arg0, %c0_i32 : i32, i32
  }
  func.func @transform_1(%arg0: i32) -> (i32, i32) {
    %c0_i32 = arith.constant 0 : i32
    %c0_i32_0 = arith.constant 0 : i32
    %c0_i32_1 = arith.constant 0 : i32
    return %c0_i32, %c0_i32_0 : i32, i32
  }
  func.func @transform_2(%arg0: i32) -> (i32, i32) {
    %c0_i32 = arith.constant 0 : i32
    %c0_i32_0 = arith.constant 0 : i32
    %c0_i32_1 = arith.constant 0 : i32
    return %c0_i32, %c0_i32_0 : i32, i32
  }
  func.func @transform_3(%arg0: i32) -> (i32, i32) {
    %c0_i32 = arith.constant 0 : i32
    %c0_i32_0 = arith.constant 0 : i32
    %c0_i32_1 = arith.constant 0 : i32
    return %c0_i32, %c0_i32_0 : i32, i32
  }
  func.func @transform_4(%arg0: i32) -> (i32, i32) {
    %c0_i32 = arith.constant 0 : i32
    %c0_i32_0 = arith.constant 0 : i32
    %c0_i32_1 = arith.constant 0 : i32
    return %c0_i32, %c0_i32_0 : i32, i32
  }
  func.func @transform_5(%arg0: i32) -> (i32, i32) {
    %c0_i32 = arith.constant 0 : i32
    %c0_i32_0 = arith.constant 0 : i32
    %c0_i32_1 = arith.constant 0 : i32
    return %c0_i32, %c0_i32_0 : i32, i32
  }
  func.func @transform_6(%arg0: i32) -> (i32, i32) {
    %c0_i32 = arith.constant 0 : i32
    %c0_i32_0 = arith.constant 0 : i32
    %c0_i32_1 = arith.constant 0 : i32
    return %c0_i32, %c0_i32_0 : i32, i32
  }
  func.func @transform_7(%arg0: i32) -> (i32, i32) {
    %c0_i32 = arith.constant 0 : i32
    %c0_i32_0 = arith.constant 0 : i32
    return %arg0, %c0_i32 : i32, i32
  }
}

module attributes {stable_mosaic.version = 11 : i64} {
  func.func @_mlp_fused_kernel(%arg0: i32, %arg1: memref<16x128xbf16, #tpu.memory_space<vmem>>, %arg2: memref<128x128xbf16, #tpu.memory_space<vmem>>, %arg3: memref<1x128xf32, #tpu.memory_space<vmem>>, %arg4: memref<128x128xbf16, #tpu.memory_space<vmem>>, %arg5: memref<1x128xf32, #tpu.memory_space<vmem>>, %arg6: memref<128x128xbf16, #tpu.memory_space<vmem>>, %arg7: memref<1x128xf32, #tpu.memory_space<vmem>>, %arg8: memref<16x128xbf16, #tpu.memory_space<vmem>>) attributes {dimension_semantics = [#tpu.dimension_semantics<parallel>], iteration_bounds = array<i64: 1>, scalar_prefetch = 0 : i64, scratch_operands = 0 : i64, tpu.core_type = #tpu.core_type<tc>, window_params = [{transform_indices = @transform_0, window_bounds = array<i64: 16, 128>}, {pipeline_mode = #tpu.pipeline_mode<synchronous>, transform_indices = @transform_1, window_bounds = array<i64: 128, 128>}, {pipeline_mode = #tpu.pipeline_mode<synchronous>, transform_indices = @transform_2, window_bounds = array<i64: 1, 128>}, {pipeline_mode = #tpu.pipeline_mode<synchronous>, transform_indices = @transform_3, window_bounds = array<i64: 128, 128>}, {pipeline_mode = #tpu.pipeline_mode<synchronous>, transform_indices = @transform_4, window_bounds = array<i64: 1, 128>}, {pipeline_mode = #tpu.pipeline_mode<synchronous>, transform_indices = @transform_5, window_bounds = array<i64: 128, 128>}, {pipeline_mode = #tpu.pipeline_mode<synchronous>, transform_indices = @transform_6, window_bounds = array<i64: 1, 128>}, {transform_indices = @transform_7, window_bounds = array<i64: 16, 128>}]} {
    %c0 = arith.constant 0 : index
    %c0_0 = arith.constant 0 : index
    %0 = vector.load %arg1[%c0, %c0_0] : memref<16x128xbf16, #tpu.memory_space<vmem>>, vector<16x128xbf16>
    %c0_1 = arith.constant 0 : index
    %c0_2 = arith.constant 0 : index
    %1 = vector.load %arg2[%c0_1, %c0_2] : memref<128x128xbf16, #tpu.memory_space<vmem>>, vector<128x128xbf16>
    %cst = arith.constant dense<0.000000e+00> : vector<16x128xf32>
    %2 = tpu.matmul %0, %1, %cst {dimension_numbers = #tpu.dot_dimension_numbers<[1], [0], [0], [1], [0, 0, 1, 1], [], []>} : vector<16x128xbf16>, vector<128x128xbf16>, vector<16x128xf32> -> vector<16x128xf32>
    %c0_3 = arith.constant 0 : index
    %c0_4 = arith.constant 0 : index
    %3 = vector.load %arg3[%c0_3, %c0_4] : memref<1x128xf32, #tpu.memory_space<vmem>>, vector<1x128xf32>
    %4 = vector.broadcast %3 : vector<1x128xf32> to vector<16x128xf32>
    %5 = arith.addf %2, %4 : vector<16x128xf32>
    %cst_5 = arith.constant 0.000000e+00 : f32
    %6 = vector.broadcast %cst_5 : f32 to vector<16x128xf32>
    %7 = arith.maximumf %5, %6 : vector<16x128xf32>
    %8 = arith.truncf %7 : vector<16x128xf32> to vector<16x128xbf16>
    %c0_6 = arith.constant 0 : index
    %c0_7 = arith.constant 0 : index
    %9 = vector.load %arg4[%c0_6, %c0_7] : memref<128x128xbf16, #tpu.memory_space<vmem>>, vector<128x128xbf16>
    %cst_8 = arith.constant dense<0.000000e+00> : vector<16x128xf32>
    %10 = tpu.matmul %8, %9, %cst_8 {dimension_numbers = #tpu.dot_dimension_numbers<[1], [0], [0], [1], [0, 0, 1, 1], [], []>} : vector<16x128xbf16>, vector<128x128xbf16>, vector<16x128xf32> -> vector<16x128xf32>
    %c0_9 = arith.constant 0 : index
    %c0_10 = arith.constant 0 : index
    %11 = vector.load %arg5[%c0_9, %c0_10] : memref<1x128xf32, #tpu.memory_space<vmem>>, vector<1x128xf32>
    %12 = vector.broadcast %11 : vector<1x128xf32> to vector<16x128xf32>
    %13 = arith.addf %10, %12 : vector<16x128xf32>
    %cst_11 = arith.constant 0.000000e+00 : f32
    %14 = vector.broadcast %cst_11 : f32 to vector<16x128xf32>
    %15 = arith.maximumf %13, %14 : vector<16x128xf32>
    %16 = arith.truncf %15 : vector<16x128xf32> to vector<16x128xbf16>
    %c0_12 = arith.constant 0 : index
    %c0_13 = arith.constant 0 : index
    %17 = vector.load %arg6[%c0_12, %c0_13] : memref<128x128xbf16, #tpu.memory_space<vmem>>, vector<128x128xbf16>
    %cst_14 = arith.constant dense<0.000000e+00> : vector<16x128xf32>
    %18 = tpu.matmul %16, %17, %cst_14 {dimension_numbers = #tpu.dot_dimension_numbers<[1], [0], [0], [1], [0, 0, 1, 1], [], []>} : vector<16x128xbf16>, vector<128x128xbf16>, vector<16x128xf32> -> vector<16x128xf32>
    %c0_15 = arith.constant 0 : index
    %c0_16 = arith.constant 0 : index
    %19 = vector.load %arg7[%c0_15, %c0_16] : memref<1x128xf32, #tpu.memory_space<vmem>>, vector<1x128xf32>
    %20 = vector.broadcast %19 : vector<1x128xf32> to vector<16x128xf32>
    %21 = arith.addf %18, %20 : vector<16x128xf32>
    %22 = math.tanh %21 : vector<16x128xf32>
    %23 = arith.truncf %22 : vector<16x128xf32> to vector<16x128xbf16>
    %c0_17 = arith.constant 0 : index
    %c0_18 = arith.constant 0 : index
    %24 = vector.load %arg8[%c0_17, %c0_18] : memref<16x128xbf16, #tpu.memory_space<vmem>>, vector<16x128xbf16>
    tpu.vector_store %arg8[%c0_17, %c0_18], %23 {strides = array<i32>} : memref<16x128xbf16, #tpu.memory_space<vmem>>, vector<16x128xbf16>,
    return
  }
  func.func @transform_0(%arg0: i32) -> (i32, i32) {
    %c0_i32 = arith.constant 0 : i32
    %c0_i32_0 = arith.constant 0 : i32
    return %arg0, %c0_i32 : i32, i32
  }
  func.func @transform_1(%arg0: i32) -> (i32, i32) {
    %c0_i32 = arith.constant 0 : i32
    %c0_i32_0 = arith.constant 0 : i32
    %c0_i32_1 = arith.constant 0 : i32
    return %c0_i32, %c0_i32_0 : i32, i32
  }
  func.func @transform_2(%arg0: i32) -> (i32, i32) {
    %c0_i32 = arith.constant 0 : i32
    %c0_i32_0 = arith.constant 0 : i32
    %c0_i32_1 = arith.constant 0 : i32
    return %c0_i32, %c0_i32_0 : i32, i32
  }
  func.func @transform_3(%arg0: i32) -> (i32, i32) {
    %c0_i32 = arith.constant 0 : i32
    %c0_i32_0 = arith.constant 0 : i32
    %c0_i32_1 = arith.constant 0 : i32
    return %c0_i32, %c0_i32_0 : i32, i32
  }
  func.func @transform_4(%arg0: i32) -> (i32, i32) {
    %c0_i32 = arith.constant 0 : i32
    %c0_i32_0 = arith.constant 0 : i32
    %c0_i32_1 = arith.constant 0 : i32
    return %c0_i32, %c0_i32_0 : i32, i32
  }
  func.func @transform_5(%arg0: i32) -> (i32, i32) {
    %c0_i32 = arith.constant 0 : i32
    %c0_i32_0 = arith.constant 0 : i32
    %c0_i32_1 = arith.constant 0 : i32
    return %c0_i32, %c0_i32_0 : i32, i32
  }
  func.func @transform_6(%arg0: i32) -> (i32, i32) {
    %c0_i32 = arith.constant 0 : i32
    %c0_i32_0 = arith.constant 0 : i32
    %c0_i32_1 = arith.constant 0 : i32
    return %c0_i32, %c0_i32_0 : i32, i32
  }
  func.func @transform_7(%arg0: i32) -> (i32, i32) {
    %c0_i32 = arith.constant 0 : i32
    %c0_i32_0 = arith.constant 0 : i32
    return %arg0, %c0_i32 : i32, i32
  }
}

module attributes {stable_mosaic.version = 11 : i64} {
  func.func @_linear_act_tiled_kernel(%arg0: i32, %arg1: i32, %arg2: i32, %arg3: memref<16x128xbf16, #tpu.memory_space<vmem>>, %arg4: memref<128x128xbf16, #tpu.memory_space<vmem>>, %arg5: memref<1x128xf32, #tpu.memory_space<vmem>>, %arg6: memref<16x128xbf16, #tpu.memory_space<vmem>>, %arg7: memref<16x128xf32, #tpu.memory_space<vmem>>) attributes {dimension_semantics = [#tpu.dimension_semantics<parallel>, #tpu.dimension_semantics<parallel>, #tpu.dimension_semantics<arbitrary>], iteration_bounds = array<i64: 1, 1, 1>, scalar_prefetch = 0 : i64, scratch_operands = 1 : i64, tpu.core_type = #tpu.core_type<tc>, window_params = [{transform_indices = @transform_0, window_bounds = array<i64: 16, 128>}, {transform_indices = @transform_1, window_bounds = array<i64: 128, 128>}, {transform_indices = @transform_2, window_bounds = array<i64: 1, 128>}, {transform_indices = @transform_3, window_bounds = array<i64: 16, 128>}]} {
    %c0_i32 = arith.constant 0 : i32
    %0 = arith.cmpi eq, %arg2, %c0_i32 : i32
    %1 = arith.extui %0 : i1 to i32
    %c0_i32_0 = arith.constant 0 : i32
    %2 = arith.cmpi ne, %1, %c0_i32_0 : i32
    scf.if %2 {
      %cst_10 = arith.constant 0.000000e+00 : f32
      %12 = vector.broadcast %cst_10 : f32 to vector<16x128xf32>
      %c0_11 = arith.constant 0 : index
      %c0_12 = arith.constant 0 : index
      %13 = vector.load %arg7[%c0_11, %c0_12] : memref<16x128xf32, #tpu.memory_space<vmem>>, vector<16x128xf32>
      tpu.vector_store %arg7[%c0_11, %c0_12], %12 {strides = array<i32>} : memref<16x128xf32, #tpu.memory_space<vmem>>, vector<16x128xf32>,
    } else {
    }
    %c0 = arith.constant 0 : index
    %c0_1 = arith.constant 0 : index
    %3 = vector.load %arg7[%c0, %c0_1] : memref<16x128xf32, #tpu.memory_space<vmem>>, vector<16x128xf32>
    %c0_2 = arith.constant 0 : index
    %c0_3 = arith.constant 0 : index
    %4 = vector.load %arg3[%c0_2, %c0_3] : memref<16x128xbf16, #tpu.memory_space<vmem>>, vector<16x128xbf16>
    %c0_4 = arith.constant 0 : index
    %c0_5 = arith.constant 0 : index
    %5 = vector.load %arg4[%c0_4, %c0_5] : memref<128x128xbf16, #tpu.memory_space<vmem>>, vector<128x128xbf16>
    %cst = arith.constant dense<0.000000e+00> : vector<16x128xf32>
    %6 = tpu.matmul %4, %5, %cst {dimension_numbers = #tpu.dot_dimension_numbers<[1], [0], [0], [1], [0, 0, 1, 1], [], []>} : vector<16x128xbf16>, vector<128x128xbf16>, vector<16x128xf32> -> vector<16x128xf32>
    %7 = arith.addf %3, %6 : vector<16x128xf32>
    %c0_6 = arith.constant 0 : index
    %c0_7 = arith.constant 0 : index
    %8 = vector.load %arg7[%c0_6, %c0_7] : memref<16x128xf32, #tpu.memory_space<vmem>>, vector<16x128xf32>
    tpu.vector_store %arg7[%c0_6, %c0_7], %7 {strides = array<i32>} : memref<16x128xf32, #tpu.memory_space<vmem>>, vector<16x128xf32>,
    %c0_i32_8 = arith.constant 0 : i32
    %9 = arith.cmpi eq, %arg2, %c0_i32_8 : i32
    %10 = arith.extui %9 : i1 to i32
    %c0_i32_9 = arith.constant 0 : i32
    %11 = arith.cmpi ne, %10, %c0_i32_9 : i32
    scf.if %11 {
      %c0_10 = arith.constant 0 : index
      %c0_11 = arith.constant 0 : index
      %12 = vector.load %arg7[%c0_10, %c0_11] : memref<16x128xf32, #tpu.memory_space<vmem>>, vector<16x128xf32>
      %c0_12 = arith.constant 0 : index
      %c0_13 = arith.constant 0 : index
      %13 = vector.load %arg5[%c0_12, %c0_13] : memref<1x128xf32, #tpu.memory_space<vmem>>, vector<1x128xf32>
      %14 = vector.broadcast %13 : vector<1x128xf32> to vector<16x128xf32>
      %15 = arith.addf %12, %14 : vector<16x128xf32>
      %cst_14 = arith.constant 0.000000e+00 : f32
      %16 = vector.broadcast %cst_14 : f32 to vector<16x128xf32>
      %17 = arith.maximumf %15, %16 : vector<16x128xf32>
      %18 = arith.truncf %17 : vector<16x128xf32> to vector<16x128xbf16>
      %c0_15 = arith.constant 0 : index
      %c0_16 = arith.constant 0 : index
      %19 = vector.load %arg6[%c0_15, %c0_16] : memref<16x128xbf16, #tpu.memory_space<vmem>>, vector<16x128xbf16>
      tpu.vector_store %arg6[%c0_15, %c0_16], %18 {strides = array<i32>} : memref<16x128xbf16, #tpu.memory_space<vmem>>, vector<16x128xbf16>,
    } else {
    }
    return
  }
  func.func @transform_0(%arg0: i32, %arg1: i32, %arg2: i32) -> (i32, i32) {
    %c0_i32 = arith.constant 0 : i32
    return %arg0, %arg2 : i32, i32
  }
  func.func @transform_1(%arg0: i32, %arg1: i32, %arg2: i32) -> (i32, i32) {
    %c0_i32 = arith.constant 0 : i32
    return %arg2, %arg1 : i32, i32
  }
  func.func @transform_2(%arg0: i32, %arg1: i32, %arg2: i32) -> (i32, i32) {
    %c0_i32 = arith.constant 0 : i32
    %c0_i32_0 = arith.constant 0 : i32
    return %c0_i32, %arg1 : i32, i32
  }
  func.func @transform_3(%arg0: i32, %arg1: i32, %arg2: i32) -> (i32, i32) {
    %c0_i32 = arith.constant 0 : i32
    return %arg0, %arg1 : i32, i32
  }
}

</mosaic_0001>

<bundles_post_ra>
// kernel: tpu_custom_call.1
= control target key start
LH: loop header
LB: loop body
LE: loop exit
PB: predicated region body
PF: predicated region fallthrough
CT: control target
= control target key end

     0   :  { %12 = vsyncpa [#allocation3], 0  ;;  %s735_s0 = inlined_call_operand.hbm [shape: bf16[16,128], index: 0, kind: input, shape index: {}]   ;;  %s736_s1 = inlined_call_operand.hbm [shape: bf16[128,128], index: 1, kind: input, shape index: {}]   ;;  %s737_s2 = inlined_call_operand.vmem [shape: f32[1,128], index: 2, kind: input, shape index: {}]   ;;  %s738_s3 = inlined_call_operand.hbm [shape: bf16[128,128], index: 3, kind: input, shape index: {}]   ;;  %s739_s4 = inlined_call_operand.vmem [shape: f32[1,128], index: 4, kind: input, shape index: {}]   ;;  %s740_s5 = inlined_call_operand.hbm [shape: bf16[128,128], index: 5, kind: input, shape index: {}]   ;;  %s741_s6 = inlined_call_operand.vmem [shape: f32[1,128], index: 6, kind: input, shape index: {}]   ;;  %s742_s7 = inlined_call_operand.hbm [shape: bf16[16,128], index: 7, kind: output, shape index: {}]  }
   0x1   :  { %13 = vsyncpa [#allocation6], 0 }
   0x2   :  { %14 = vsyncpa [#allocation9], 0 }
   0x3   :  { %15 = vsyncpa [#allocation4], 0  ;;  %s33_s26 = sshll.u32 %s736_s1, 4  ;;  %s649_s27 = smov [#allocation5]   ;;  %s34_s26 = int_to_ptr.hbm [resolvable:$true] %s33_s26 }
   0x4   :  { %s35_s28 = sshll.u32 %s649_s27, 4  ;;  %s20_s8 = sshll.u32 %s735_s0, 4  ;;  %s36_s28 = int_to_ptr.vmem [resolvable:$true] %s35_s28  ;;  %s21_s8 = int_to_ptr.hbm [resolvable:$true] %s20_s8 }
   0x5   :  { %s650_s9 = smov 64   ;;  %s651_s10 = smov 4  }
   0x6   :  { %41 = dma.hbm_to_vmem [thread:$0]  %s34_s26, 1024, %s36_s28, [#allocation6], %s650_s9, %s650_s9, %s651_s10  }
   0x7   :  { %s652_s11 = smov [#allocation2]   ;;  %s48_s1 = sshll.u32 %s738_s3, 4  ;;  %s49_s1 = int_to_ptr.hbm [resolvable:$true] %s48_s1 }
   0x8   :  { %s22_s12 = sshll.u32 %s652_s11, 4  ;;  %s63_s16 = sshll.u32 %s740_s5, 4  ;;  %s23_s12 = int_to_ptr.vmem [resolvable:$true] %s22_s12  ;;  %s64_s16 = int_to_ptr.hbm [resolvable:$true] %s63_s16 }
   0x9   :  { %28 = dma.hbm_to_vmem [thread:$0]  %s21_s8, 128, %s23_s12, [#allocation3], %s650_s9, %s650_s9, %s651_s10  }
   0xa   :  { %s653_s17 = smov [#allocation7]   ;;  %s654_s19 = smov [#allocation8]  }
   0xb   :  { %s50_s18 = sshll.u32 %s653_s17, 4  ;;  %s65_s3 = sshll.u32 %s654_s19, 4  ;;  %s51_s18 = int_to_ptr.vmem [resolvable:$true] %s50_s18  ;;  %s66_s3 = int_to_ptr.vmem [resolvable:$true] %s65_s3 }
   0xc   :  { %56 = dma.hbm_to_vmem [thread:$0]  %s49_s1, 1024, %s51_s18, [#allocation6], %s650_s9, %s650_s9, %s651_s10  }
   0xd   :  { %71 = dma.hbm_to_vmem [thread:$0]  %s64_s16, 1024, %s66_s3, [#allocation9], %s650_s9, %s650_s9, %s651_s10  }
   0xe   :  { %641 = dma.done.wait [#allocation3], 128  }
   0xf   :  { %642 = vsyncadd [#allocation3], 4294967168 }
  0x10   :  { %643 = dma.done.wait [#allocation6], 2048  }
  0x11   :  { %644 = vsyncadd [#allocation6], 4294965248 }
  0x12   :  { %645 = dma.done.wait [#allocation9], 1024  }
  0x13   :  { %646 = vsyncadd [#allocation9], 4294966272  ;;  %v485_v0 = vld [vmem:[#allocation5 + $0x38] sm:$0xff]  ;;  %v484_v1 = vld [vmem:[#allocation5 + $0x30] sm:$0xff]  ;;  %s655_s24 = smov [#allocation10]   ;;  %s362_s27 = sshll.u32 %s742_s7, 4  ;;  %s363_s27 = int_to_ptr.hbm [resolvable:$true] %s362_s27 }
  0x14   :  { %166 = vmatpush.bf16.msra.mxu0 %v485_v0  ;;  %v493_v2 = vld [vmem:[#allocation7 + $0x38] sm:$0xff]  ;;  %v492_v3 = vld [vmem:[#allocation7 + $0x30] sm:$0xff]  ;;  %v483_v4 = vld [vmem:[#allocation5 + $0x28] sm:$0xff]  ;;  %s360_s25 = sshll.u32 %s655_s24, 4  ;;  %s361_s25 = int_to_ptr.vmem [resolvable:$true] %s360_s25 }
  0x15   :  { %251 = vmatpush.bf16.msra.mxu1 %v493_v2  ;;  %v491_v5 = vld [vmem:[#allocation7 + $0x28] sm:$0xff]  ;;  %v482_v6 = vld [vmem:[#allocation5 + $0x20] sm:$0xff]  ;;  %v481_v8 = vld [vmem:[#allocation5 + $0x18] sm:$0xff] }
  0x16   :  { %v490_v7 = vld [vmem:[#allocation7 + $0x20] sm:$0xff]  ;;  %v480_v9 = vld [vmem:[#allocation5 + $0x10] sm:$0xff]  ;;  %v479_v10 = vld [vmem:[#allocation5 + $0x8] sm:$0xff] }
  0x17   :  { %v478_v11 = vld [vmem:[#allocation5] sm:$0xff]  ;;  %v477_v12 = vld [vmem:[#allocation2] sm:$0xff]  ;;  %v488_v14 = vld [vmem:[#allocation7 + $0x10] sm:$0xff] }
  0x18   :  { %167 = vmatpush.bf16.msra.mxu0 %v484_v1  ;;  %v489_v13 = vld [vmem:[#allocation7 + $0x18] sm:$0xff]  ;;  %v487_v15 = vld [vmem:[#allocation7 + $0x8] sm:$0xff]  ;;  %v486_v16 = vld [vmem:[#allocation7] sm:$0xff] }
  0x19   :  { %252 = vmatpush.bf16.msra.mxu1 %v492_v3  ;;  %v501_v17 = vld [vmem:[#allocation8 + $0x38] sm:$0xff]  ;;  %v500_v18 = vld [vmem:[#allocation8 + $0x30] sm:$0xff]  ;;  %v499_v19 = vld [vmem:[#allocation8 + $0x28] sm:$0xff] }
  0x1a   :  { %336 = vmatpush.bf16.msra.mxu2 %v501_v17  ;;  %v498_v20 = vld [vmem:[#allocation8 + $0x20] sm:$0xff]  ;;  %v514_v22 = vld [vmem:[%s737_s2] ss:$0 sm:$0xff]  ;;  %v496_v30 = vld [vmem:[#allocation8 + $0x10] sm:$0xff] }
  0x1b   :  { %v497_v29 = vld [vmem:[#allocation8 + $0x18] sm:$0xff]  ;;  %v495_v31 = vld [vmem:[#allocation8 + $0x8] sm:$0xff]  ;;  %v494_v32 = vld [vmem:[#allocation8] sm:$0xff] }
  0x1c   :  { %168 = vmatpush.bf16.msra.mxu0 %v483_v4  ;;  %v515_v34 = vld [vmem:[%s739_s4] ss:$0 sm:$0xff] }
  0x1d   :  { %253 = vmatpush.bf16.msra.mxu1 %v491_v5  ;;  %v516_v42 = vld [vmem:[%s741_s6] ss:$0 sm:$0xff] }
  0x1e   :  { %337 = vmatpush.bf16.msra.mxu2 %v500_v18 }
  0x20   :  { %169 = vmatpush.bf16.msra.mxu0 %v482_v6 }
  0x21   :  { %254 = vmatpush.bf16.msra.mxu1 %v490_v7 }
  0x22   :  { %338 = vmatpush.bf16.msra.mxu2 %v499_v19 }
  0x24   :  { %170 = vmatpush.bf16.msra.mxu0 %v481_v8 }
  0x25   :  { %255 = vmatpush.bf16.msra.mxu1 %v489_v13 }
  0x26   :  { %339 = vmatpush.bf16.msra.mxu2 %v498_v20 }
  0x28   :  { %171 = vmatpush.bf16.msra.mxu0 %v480_v9 }
  0x29   :  { %256 = vmatpush.bf16.msra.mxu1 %v488_v14 }
  0x2a   :  { %340 = vmatpush.bf16.msra.mxu2 %v497_v29 }
  0x2c   :  { %172 = vmatpush.bf16.msra.mxu0 %v479_v10 }
  0x2d   :  { %257 = vmatpush.bf16.msra.mxu1 %v487_v15 }
  0x2e   :  { %341 = vmatpush.bf16.msra.mxu2 %v496_v30 }
  0x30   :  { %173 = vmatpush.bf16.msra.mxu0 %v478_v11 }
  0x31   :  { %258 = vmatpush.bf16.msra.mxu1 %v486_v16 }
  0x32   :  { %342 = vmatpush.bf16.msra.mxu2 %v495_v31 }
  0x33   :  { %174 = vmatmul.bf16.vlgmr.msra.gmra.mxu0 %v477_v12 }
  0x36   :  { %343 = vmatpush.bf16.msra.mxu2 %v494_v32 }
  0xb0   :  { %v175_v21 = vpop.f32.mrf.mxu0 }
  0xb1   :  { %v176_v23 = vadd.f32 %v514_v22, %v175_v21 }
  0xb3   :  { %v180_v26 = vmax.f32 %v176_v23, 0.0 }
  0xb8   :  { %v177_v24 = vpop.f32.mrf.mxu0 }
  0xb9   :  { %v178_v25 = vadd.f32 %v514_v22, %v177_v24 }
  0xbb   :  { %v181_v27 = vmax.f32 %v178_v25, 0.0 }
  0xbd   :  { %v182_v28 = vpack.c.bf16 %v181_v27, %v180_v26 }
  0xbf   :  { %259 = vmatmul.bf16.vlgmr.msra.gmra.mxu1 %v182_v28 }
 0x13c   :  { %v260_v33 = vpop.f32.mrf.mxu1 }
 0x13d   :  { %v261_v35 = vadd.f32 %v515_v34, %v260_v33 }
 0x13f   :  { %v265_v38 = vmax.f32 %v261_v35, 0.0 }
 0x144   :  { %v262_v36 = vpop.f32.mrf.mxu1 }
 0x145   :  { %v263_v37 = vadd.f32 %v515_v34, %v262_v36 }
 0x147   :  { %v266_v39 = vmax.f32 %v263_v37, 0.0 }
 0x149   :  { %v267_v40 = vpack.c.bf16 %v266_v39, %v265_v38 }
 0x14b   :  { %344 = vmatmul.bf16.vlgmr.msra.gmra.mxu2 %v267_v40 }
 0x1ce   :  { %v345_v41 = vpop.f32.mrf.mxu2 }
 0x1cf   :  { %v346_v43 = vadd.f32 %v516_v42, %v345_v41 }
 0x1d1   :  { %517 = vtanh.f32 %v346_v43 }
 0x1d6   :  { %v347_v44 = vpop.f32.mrf.mxu2 }
 0x1d7   :  { %v348_v45 = vadd.f32 %v516_v42, %v347_v44  ;;  %v518_v46 = vpop.eup %517 }
 0x1d9   :  { %519 = vtanh.f32 %v348_v45 }
 0x1df   :  { %v520_v47 = vpop.eup %519 }
 0x1e0   :  { %v505_v48 = vpack.c.bf16 %v520_v47, %v518_v46 }
 0x1e2   :  { %506 = vst [vmem:[#allocation10] sm:$0xff] %v505_v48  }
 0x1e3   :  { %368 = dma.vmem_to_hbm [thread:$0]  %s361_s25, 128, %s363_s27, [#allocation4], %s650_s9, %s650_s9, %s651_s10  }
 0x1e4   :  { %647 = dma.done.wait [#allocation4], 128  }
 0x1e5   :  { %648 = vsyncadd [#allocation4], 4294967168 }
 0x1e6   :  { %373 = vsyncpa [#allocation3], 1 }
 0x1e7   :  { %374 = vsyncpa [#allocation6], 1 }
 0x1e8   :  { %375 = vsyncpa [#allocation9], 1 }
 0x1e9   :  { %376 = vsyncpa [#allocation4], 1 }

// kernel: tpu_custom_call.1
= control target key start
LH: loop header
LB: loop body
LE: loop exit
PB: predicated region body
PF: predicated region fallthrough
CT: control target
= control target key end

     0   :  { %12 = vsyncpa [#allocation3], 0  ;;  %s735_s0 = inlined_call_operand.hbm [shape: bf16[16,128], index: 0, kind: input, shape index: {}]   ;;  %s736_s1 = inlined_call_operand.hbm [shape: bf16[128,128], index: 1, kind: input, shape index: {}]   ;;  %s737_s2 = inlined_call_operand.vmem [shape: f32[1,128], index: 2, kind: input, shape index: {}]   ;;  %s738_s3 = inlined_call_operand.hbm [shape: bf16[128,128], index: 3, kind: input, shape index: {}]   ;;  %s739_s4 = inlined_call_operand.vmem [shape: f32[1,128], index: 4, kind: input, shape index: {}]   ;;  %s740_s5 = inlined_call_operand.hbm [shape: bf16[128,128], index: 5, kind: input, shape index: {}]   ;;  %s741_s6 = inlined_call_operand.vmem [shape: f32[1,128], index: 6, kind: input, shape index: {}]   ;;  %s742_s7 = inlined_call_operand.hbm [shape: bf16[16,128], index: 7, kind: output, shape index: {}]  }
   0x1   :  { %13 = vsyncpa [#allocation6], 0 }
   0x2   :  { %14 = vsyncpa [#allocation9], 0 }
   0x3   :  { %15 = vsyncpa [#allocation4], 0  ;;  %s33_s26 = sshll.u32 %s736_s1, 4  ;;  %s649_s27 = smov [#allocation5]   ;;  %s34_s26 = int_to_ptr.hbm [resolvable:$true] %s33_s26 }
   0x4   :  { %s35_s28 = sshll.u32 %s649_s27, 4  ;;  %s20_s8 = sshll.u32 %s735_s0, 4  ;;  %s36_s28 = int_to_ptr.vmem [resolvable:$true] %s35_s28  ;;  %s21_s8 = int_to_ptr.hbm [resolvable:$true] %s20_s8 }
   0x5   :  { %s650_s9 = smov 64   ;;  %s651_s10 = smov 4  }
   0x6   :  { %41 = dma.hbm_to_vmem [thread:$0]  %s34_s26, 1024, %s36_s28, [#allocation6], %s650_s9, %s650_s9, %s651_s10  }
   0x7   :  { %s652_s11 = smov [#allocation2]   ;;  %s48_s1 = sshll.u32 %s738_s3, 4  ;;  %s49_s1 = int_to_ptr.hbm [resolvable:$true] %s48_s1 }
   0x8   :  { %s22_s12 = sshll.u32 %s652_s11, 4  ;;  %s63_s16 = sshll.u32 %s740_s5, 4  ;;  %s23_s12 = int_to_ptr.vmem [resolvable:$true] %s22_s12  ;;  %s64_s16 = int_to_ptr.hbm [resolvable:$true] %s63_s16 }
   0x9   :  { %28 = dma.hbm_to_vmem [thread:$0]  %s21_s8, 128, %s23_s12, [#allocation3], %s650_s9, %s650_s9, %s651_s10  }
   0xa   :  { %s653_s17 = smov [#allocation7]   ;;  %s654_s19 = smov [#allocation8]  }
   0xb   :  { %s50_s18 = sshll.u32 %s653_s17, 4  ;;  %s65_s3 = sshll.u32 %s654_s19, 4  ;;  %s51_s18 = int_to_ptr.vmem [resolvable:$true] %s50_s18  ;;  %s66_s3 = int_to_ptr.vmem [resolvable:$true] %s65_s3 }
   0xc   :  { %56 = dma.hbm_to_vmem [thread:$0]  %s49_s1, 1024, %s51_s18, [#allocation6], %s650_s9, %s650_s9, %s651_s10  }
   0xd   :  { %71 = dma.hbm_to_vmem [thread:$0]  %s64_s16, 1024, %s66_s3, [#allocation9], %s650_s9, %s650_s9, %s651_s10  }
   0xe   :  { %641 = dma.done.wait [#allocation3], 128  }
   0xf   :  { %642 = vsyncadd [#allocation3], 4294967168 }
  0x10   :  { %643 = dma.done.wait [#allocation6], 2048  }
  0x11   :  { %644 = vsyncadd [#allocation6], 4294965248 }
  0x12   :  { %645 = dma.done.wait [#allocation9], 1024  }
  0x13   :  { %646 = vsyncadd [#allocation9], 4294966272  ;;  %v485_v0 = vld [vmem:[#allocation5 + $0x38] sm:$0xff]  ;;  %v484_v1 = vld [vmem:[#allocation5 + $0x30] sm:$0xff]  ;;  %s655_s24 = smov [#allocation10]   ;;  %s362_s27 = sshll.u32 %s742_s7, 4  ;;  %s363_s27 = int_to_ptr.hbm [resolvable:$true] %s362_s27 }
  0x14   :  { %166 = vmatpush.bf16.msra.mxu0 %v485_v0  ;;  %v493_v2 = vld [vmem:[#allocation7 + $0x38] sm:$0xff]  ;;  %v492_v3 = vld [vmem:[#allocation7 + $0x30] sm:$0xff]  ;;  %v483_v4 = vld [vmem:[#allocation5 + $0x28] sm:$0xff]  ;;  %s360_s25 = sshll.u32 %s655_s24, 4  ;;  %s361_s25 = int_to_ptr.vmem [resolvable:$true] %s360_s25 }
  0x15   :  { %251 = vmatpush.bf16.msra.mxu1 %v493_v2  ;;  %v491_v5 = vld [vmem:[#allocation7 + $0x28] sm:$0xff]  ;;  %v482_v6 = vld [vmem:[#allocation5 + $0x20] sm:$0xff]  ;;  %v481_v8 = vld [vmem:[#allocation5 + $0x18] sm:$0xff] }
  0x16   :  { %v490_v7 = vld [vmem:[#allocation7 + $0x20] sm:$0xff]  ;;  %v480_v9 = vld [vmem:[#allocation5 + $0x10] sm:$0xff]  ;;  %v479_v10 = vld [vmem:[#allocation5 + $0x8] sm:$0xff] }
  0x17   :  { %v478_v11 = vld [vmem:[#allocation5] sm:$0xff]  ;;  %v477_v12 = vld [vmem:[#allocation2] sm:$0xff]  ;;  %v488_v14 = vld [vmem:[#allocation7 + $0x10] sm:$0xff] }
  0x18   :  { %167 = vmatpush.bf16.msra.mxu0 %v484_v1  ;;  %v489_v13 = vld [vmem:[#allocation7 + $0x18] sm:$0xff]  ;;  %v487_v15 = vld [vmem:[#allocation7 + $0x8] sm:$0xff]  ;;  %v486_v16 = vld [vmem:[#allocation7] sm:$0xff] }
  0x19   :  { %252 = vmatpush.bf16.msra.mxu1 %v492_v3  ;;  %v501_v17 = vld [vmem:[#allocation8 + $0x38] sm:$0xff]  ;;  %v500_v18 = vld [vmem:[#allocation8 + $0x30] sm:$0xff]  ;;  %v499_v19 = vld [vmem:[#allocation8 + $0x28] sm:$0xff] }
  0x1a   :  { %336 = vmatpush.bf16.msra.mxu2 %v501_v17  ;;  %v498_v20 = vld [vmem:[#allocation8 + $0x20] sm:$0xff]  ;;  %v514_v22 = vld [vmem:[%s737_s2] ss:$0 sm:$0xff]  ;;  %v496_v30 = vld [vmem:[#allocation8 + $0x10] sm:$0xff] }
  0x1b   :  { %v497_v29 = vld [vmem:[#allocation8 + $0x18] sm:$0xff]  ;;  %v495_v31 = vld [vmem:[#allocation8 + $0x8] sm:$0xff]  ;;  %v494_v32 = vld [vmem:[#allocation8] sm:$0xff] }
  0x1c   :  { %168 = vmatpush.bf16.msra.mxu0 %v483_v4  ;;  %v515_v34 = vld [vmem:[%s739_s4] ss:$0 sm:$0xff] }
  0x1d   :  { %253 = vmatpush.bf16.msra.mxu1 %v491_v5  ;;  %v516_v42 = vld [vmem:[%s741_s6] ss:$0 sm:$0xff] }
  0x1e   :  { %337 = vmatpush.bf16.msra.mxu2 %v500_v18 }
  0x20   :  { %169 = vmatpush.bf16.msra.mxu0 %v482_v6 }
  0x21   :  { %254 = vmatpush.bf16.msra.mxu1 %v490_v7 }
  0x22   :  { %338 = vmatpush.bf16.msra.mxu2 %v499_v19 }
  0x24   :  { %170 = vmatpush.bf16.msra.mxu0 %v481_v8 }
  0x25   :  { %255 = vmatpush.bf16.msra.mxu1 %v489_v13 }
  0x26   :  { %339 = vmatpush.bf16.msra.mxu2 %v498_v20 }
  0x28   :  { %171 = vmatpush.bf16.msra.mxu0 %v480_v9 }
  0x29   :  { %256 = vmatpush.bf16.msra.mxu1 %v488_v14 }
  0x2a   :  { %340 = vmatpush.bf16.msra.mxu2 %v497_v29 }
  0x2c   :  { %172 = vmatpush.bf16.msra.mxu0 %v479_v10 }
  0x2d   :  { %257 = vmatpush.bf16.msra.mxu1 %v487_v15 }
  0x2e   :  { %341 = vmatpush.bf16.msra.mxu2 %v496_v30 }
  0x30   :  { %173 = vmatpush.bf16.msra.mxu0 %v478_v11 }
  0x31   :  { %258 = vmatpush.bf16.msra.mxu1 %v486_v16 }
  0x32   :  { %342 = vmatpush.bf16.msra.mxu2 %v495_v31 }
  0x33   :  { %174 = vmatmul.bf16.vlgmr.msra.gmra.mxu0 %v477_v12 }
  0x36   :  { %343 = vmatpush.bf16.msra.mxu2 %v494_v32 }
  0xb0   :  { %v175_v21 = vpop.f32.mrf.mxu0 }
  0xb1   :  { %v176_v23 = vadd.f32 %v514_v22, %v175_v21 }
  0xb3   :  { %v180_v26 = vmax.f32 %v176_v23, 0.0 }
  0xb8   :  { %v177_v24 = vpop.f32.mrf.mxu0 }
  0xb9   :  { %v178_v25 = vadd.f32 %v514_v22, %v177_v24 }
  0xbb   :  { %v181_v27 = vmax.f32 %v178_v25, 0.0 }
  0xbd   :  { %v182_v28 = vpack.c.bf16 %v181_v27, %v180_v26 }
  0xbf   :  { %259 = vmatmul.bf16.vlgmr.msra.gmra.mxu1 %v182_v28 }
 0x13c   :  { %v260_v33 = vpop.f32.mrf.mxu1 }
 0x13d   :  { %v261_v35 = vadd.f32 %v515_v34, %v260_v33 }
 0x13f   :  { %v265_v38 = vmax.f32 %v261_v35, 0.0 }
 0x144   :  { %v262_v36 = vpop.f32.mrf.mxu1 }
 0x145   :  { %v263_v37 = vadd.f32 %v515_v34, %v262_v36 }
 0x147   :  { %v266_v39 = vmax.f32 %v263_v37, 0.0 }
 0x149   :  { %v267_v40 = vpack.c.bf16 %v266_v39, %v265_v38 }
 0x14b   :  { %344 = vmatmul.bf16.vlgmr.msra.gmra.mxu2 %v267_v40 }
 0x1ce   :  { %v345_v41 = vpop.f32.mrf.mxu2 }
 0x1cf   :  { %v346_v43 = vadd.f32 %v516_v42, %v345_v41 }
 0x1d1   :  { %517 = vtanh.f32 %v346_v43 }
 0x1d6   :  { %v347_v44 = vpop.f32.mrf.mxu2 }
 0x1d7   :  { %v348_v45 = vadd.f32 %v516_v42, %v347_v44  ;;  %v518_v46 = vpop.eup %517 }
 0x1d9   :  { %519 = vtanh.f32 %v348_v45 }
 0x1df   :  { %v520_v47 = vpop.eup %519 }
 0x1e0   :  { %v505_v48 = vpack.c.bf16 %v520_v47, %v518_v46 }
 0x1e2   :  { %506 = vst [vmem:[#allocation10] sm:$0xff] %v505_v48  }
 0x1e3   :  { %368 = dma.vmem_to_hbm [thread:$0]  %s361_s25, 128, %s363_s27, [#allocation4], %s650_s9, %s650_s9, %s651_s10  }
 0x1e4   :  { %647 = dma.done.wait [#allocation4], 128  }
 0x1e5   :  { %648 = vsyncadd [#allocation4], 4294967168 }
 0x1e6   :  { %373 = vsyncpa [#allocation3], 1 }
 0x1e7   :  { %374 = vsyncpa [#allocation6], 1 }
 0x1e8   :  { %375 = vsyncpa [#allocation9], 1 }
 0x1e9   :  { %376 = vsyncpa [#allocation4], 1 }

// kernel: tpu_custom_call.1
= control target key start
LH: loop header
LB: loop body
LE: loop exit
PB: predicated region body
PF: predicated region fallthrough
CT: control target
= control target key end

     0   :  { %8 = vsyncpa [#allocation4], 0  ;;  %s362_s0 = inlined_call_operand.hbm [shape: bf16[16,128], index: 0, kind: input, shape index: {}]   ;;  %s363_s1 = inlined_call_operand.hbm [shape: bf16[128,128], index: 1, kind: input, shape index: {}]   ;;  %s364_s2 = inlined_call_operand.vmem [shape: f32[1,128], index: 2, kind: input, shape index: {}]   ;;  %s365_s3 = inlined_call_operand.hbm [shape: bf16[16,128], index: 3, kind: output, shape index: {}]  }
   0x1   :  { %9 = vsyncpa [#allocation7], 0 }
   0x2   :  { %10 = vsyncpa [#allocation5], 0  ;;  %s15_s14 = sshll.u32 %s362_s0, 4  ;;  %s316_s15 = smov [#allocation3]   ;;  %s16_s14 = int_to_ptr.hbm [resolvable:$true] %s15_s14 }
   0x3   :  { %s17_s16 = sshll.u32 %s316_s15, 4  ;;  %s28_s19 = sshll.u32 %s363_s1, 4  ;;  %s18_s16 = int_to_ptr.vmem [resolvable:$true] %s17_s16  ;;  %s29_s19 = int_to_ptr.hbm [resolvable:$true] %s28_s19 }
   0x4   :  { %s317_s20 = smov 64   ;;  %s318_s21 = smov 4  }
   0x5   :  { %23 = dma.hbm_to_vmem [thread:$0]  %s16_s14, 128, %s18_s16, [#allocation4], %s317_s20, %s317_s20, %s318_s21  }
   0x6   :  { %s319_s22 = smov [#allocation6]  }
   0x7   :  { %s30_s23 = sshll.u32 %s319_s22, 4  ;;  %s31_s23 = int_to_ptr.vmem [resolvable:$true] %s30_s23 }
   0x8   :  { %36 = dma.hbm_to_vmem [thread:$0]  %s29_s19, 1024, %s31_s23, [#allocation7], %s317_s20, %s317_s20, %s318_s21  }
   0x9   :  { %310 = dma.done.wait [#allocation4], 128  }
   0xa   :  { %311 = vsyncadd [#allocation4], 4294967168 }
   0xb   :  { %312 = dma.done.wait [#allocation7], 1024  }
   0xc   :  { %313 = vsyncadd [#allocation7], 4294966272  ;;  %v226_v0 = vld [vmem:[#allocation6 + $0x38] sm:$0xff]  ;;  %v225_v1 = vld [vmem:[#allocation6 + $0x30] sm:$0xff]  ;;  %s320_s24 = smov [#allocation8]   ;;  %s168_s28 = sshll.u32 %s365_s3, 4  ;;  %s169_s28 = int_to_ptr.hbm [resolvable:$true] %s168_s28 }
   0xd   :  { %127 = vmatpush.bf16.msra.mxu0 %v226_v0  ;;  %v224_v2 = vld [vmem:[#allocation6 + $0x28] sm:$0xff]  ;;  %v223_v3 = vld [vmem:[#allocation6 + $0x20] sm:$0xff]  ;;  %v222_v4 = vld [vmem:[#allocation6 + $0x18] sm:$0xff]  ;;  %s166_s25 = sshll.u32 %s320_s24, 4  ;;  %s167_s25 = int_to_ptr.vmem [resolvable:$true] %s166_s25 }
   0xe   :  { %v221_v5 = vld [vmem:[#allocation6 + $0x10] sm:$0xff]  ;;  %v220_v6 = vld [vmem:[#allocation6 + $0x8] sm:$0xff]  ;;  %v219_v7 = vld [vmem:[#allocation6] sm:$0xff] }
   0xf   :  { %v218_v8 = vld [vmem:[#allocation3] sm:$0xff] }
  0x10   :  { %v237_v10 = vld [vmem:[%s364_s2] ss:$0 sm:$0xff] }
  0x11   :  { %128 = vmatpush.bf16.msra.mxu0 %v225_v1 }
  0x15   :  { %129 = vmatpush.bf16.msra.mxu0 %v224_v2 }
  0x19   :  { %130 = vmatpush.bf16.msra.mxu0 %v223_v3 }
  0x1d   :  { %131 = vmatpush.bf16.msra.mxu0 %v222_v4 }
  0x21   :  { %132 = vmatpush.bf16.msra.mxu0 %v221_v5 }
  0x25   :  { %133 = vmatpush.bf16.msra.mxu0 %v220_v6 }
  0x29   :  { %134 = vmatpush.bf16.msra.mxu0 %v219_v7 }
  0x2c   :  { %135 = vmatmul.bf16.vlgmr.msra.gmra.mxu0 %v218_v8 }
  0xa9   :  { %v136_v9 = vpop.f32.mrf.mxu0 }
  0xaa   :  { %v154_v11 = vadd.f32 %v237_v10, %v136_v9 }
  0xac   :  { %v156_v14 = vmax.f32 %v154_v11, 0.0 }
  0xb1   :  { %v138_v12 = vpop.f32.mrf.mxu0 }
  0xb2   :  { %v155_v13 = vadd.f32 %v237_v10, %v138_v12 }
  0xb4   :  { %v157_v15 = vmax.f32 %v155_v13, 0.0 }
  0xb6   :  { %v230_v16 = vpack.c.bf16 %v157_v15, %v156_v14 }
  0xb8   :  { %231 = vst [vmem:[#allocation8] sm:$0xff] %v230_v16  }
  0xb9   :  { %174 = dma.vmem_to_hbm [thread:$0]  %s167_s25, 128, %s169_s28, [#allocation5], %s317_s20, %s317_s20, %s318_s21  }
  0xba   :  { %314 = dma.done.wait [#allocation5], 128  }
  0xbb   :  { %315 = vsyncadd [#allocation5], 4294967168 }
  0xbc   :  { %179 = vsyncpa [#allocation4], 1 }
  0xbd   :  { %180 = vsyncpa [#allocation7], 1 }
  0xbe   :  { %181 = vsyncpa [#allocation5], 1 }

</bundles_post_ra>
